<compile_context>
chip_gen: v5e
topology: v5e:2x2
jax: 0.10.0
libtpu: 0.0.40
codegen_flags: <defaults>
</compile_context>

<pallas_src>
import math

import jax
import jax.numpy as jnp
from jax.experimental import pallas as pl
from jax.experimental.pallas import tpu as pltpu


# ---------------------------------------------------------------------------
# Fused layer kernel: leaky_relu((adj @ h) @ W + b)
# ---------------------------------------------------------------------------

def _gcn_layer_kernel(adj_ref, h_ref, w_ref, b_ref, o_ref, acc_ref):
    """Grid = (row tiles of adj, k tiles over nodes).

    acc (f32 VMEM) accumulates (adj @ h) for the current row tile; the small
    weight matmul + bias + LeakyReLU(0.1) epilogue is fused into k==last.
    """
    k = pl.program_id(1)

    @pl.when(k == 0)
    def _():
        acc_ref[...] = jnp.zeros_like(acc_ref)

    acc_ref[...] += jnp.dot(adj_ref[...], h_ref[...],
                            preferred_element_type=jnp.float32)

    @pl.when(k == pl.num_programs(1) - 1)
    def _():
        # (tm, cin_pad) @ (cin_pad, cout_pad) in f32 — tiny vs the adj matmul.
        out = jnp.dot(acc_ref[...], w_ref[...],
                      preferred_element_type=jnp.float32) + b_ref[...]
        o_ref[...] = jnp.where(out >= 0.0, out, 0.1 * out).astype(o_ref.dtype)


# ---------------------------------------------------------------------------
# Tiling / VMEM helpers
# ---------------------------------------------------------------------------

def _round_up(x, m):
    return ((x + m - 1) // m) * m


def _vmem_limit_bytes():
    """Scoped-VMEM limit derived from the actual chip (v7x has 64 MiB/TC)."""
    cap = 64 * 1024 * 1024
    try:
        info = pltpu.get_tpu_info()
        cap = int(getattr(info, "vmem_capacity_bytes", cap))
    except Exception:
        pass
    return int(min(cap - 8 * 1024 * 1024, 100 * 1024 * 1024))


_TM_CANDS = (1024, 512, 256, 128, 64, 32, 16)
_TK_CANDS = (2048, 1024, 512, 256, 128)


def _pick_tm(n_pad):
    # Prefer the largest row tile that still leaves >= 2 row tiles so both
    # v7x TensorCores get work; fall back to any divisor, then full extent.
    for c in _TM_CANDS:
        if n_pad % c == 0 and n_pad // c >= 2:
            return c
    for c in _TM_CANDS:
        if n_pad % c == 0:
            return c
    return n_pad


def _pick_tk(n_pad):
    for c in _TK_CANDS:
        if n_pad % c == 0:
            return c
    return n_pad  # full lane extent (allowed: block dim equals array dim)


def _fit_tiles(tm, tk, n_pad, cin_pad, cout_pad, out_bytes, limit):
    """Shrink tiles (keeping divisibility) until the double-buffered working
    set fits comfortably under the VMEM limit."""
    def usage(tm_, tk_):
        return (2 * tm_ * tk_ * 2              # adj tile, bf16, double-buffered
                + 2 * tk_ * cin_pad * 2        # h tile, bf16, double-buffered
                + 2 * cin_pad * cout_pad * 4   # W (f32)
                + 2 * cout_pad * 4             # bias
                + tm_ * cin_pad * 4            # f32 accumulator
                + 2 * tm_ * cout_pad * out_bytes)  # output tile

    budget = int(limit * 0.8)
    while usage(tm, tk) > budget and tk > 128 and n_pad % (tk // 2) == 0:
        tk //= 2
    while usage(tm, tk) > budget and tm > 16 and n_pad % (tm // 2) == 0:
        tm //= 2
    return tm, tk


# ---------------------------------------------------------------------------
# Fused layer wrapper
# ---------------------------------------------------------------------------

def _gcn_layer(adj_p, h, w_p, b_p, *, out_dtype):
    """leaky_relu((adj_p @ h) @ w_p + b_p, 0.1) as one pallas_call.

    adj_p: (N_pad, N_pad) bf16, h: (N_pad, Cin_pad) bf16,
    w_p: (Cin_pad, Cout_pad) f32, b_p: (1, Cout_pad) f32.
    """
    n_pad = adj_p.shape[0]
    cin_pad = h.shape[1]
    cout_pad = w_p.shape[1]

    limit = _vmem_limit_bytes()
    out_bytes = jnp.dtype(out_dtype).itemsize
    tm = _pick_tm(n_pad)
    tk = _pick_tk(n_pad)
    tm, tk = _fit_tiles(tm, tk, n_pad, cin_pad, cout_pad, out_bytes, limit)

    grid = (n_pad // tm, n_pad // tk)

    return pl.pallas_call(
        _gcn_layer_kernel,
        out_shape=jax.ShapeDtypeStruct((n_pad, cout_pad), out_dtype),
        grid_spec=pltpu.PrefetchScalarGridSpec(
            num_scalar_prefetch=0,
            grid=grid,
            in_specs=[
                pl.BlockSpec((tm, tk), lambda i, k: (i, k)),          # adj
                pl.BlockSpec((tk, cin_pad), lambda i, k: (k, 0)),     # h
                pl.BlockSpec((cin_pad, cout_pad), lambda i, k: (0, 0)),  # W (VMEM-resident)
                pl.BlockSpec((1, cout_pad), lambda i, k: (0, 0)),     # bias
            ],
            out_specs=pl.BlockSpec((tm, cout_pad), lambda i, k: (i, 0)),
            scratch_shapes=[pltpu.VMEM((tm, cin_pad), jnp.float32)],
        ),
        compiler_params=pltpu.CompilerParams(
            dimension_semantics=("parallel", "arbitrary"),
            vmem_limit_bytes=limit,
        ),
    )(adj_p, h, w_p, b_p)


# ---------------------------------------------------------------------------
# GCN model
# ---------------------------------------------------------------------------

_SUBLANE = 16   # bf16 sublane packing — node-dim padding granularity
_LANE = 128     # feature-dim padding granularity (lane-dense outputs)


def init_gcn_params(key, channels):
    """Matches GraphConvolution.reset_parameters:
    weight ~ U(-stdv, stdv), stdv = sqrt(6 / (fan_in + fan_out)); bias = 0."""
    params = []
    for i in range(len(channels) - 1):
        cin, cout = channels[i], channels[i + 1]
        key, sub = jax.random.split(key)
        stdv = math.sqrt(6.0 / (cin + cout))
        w = jax.random.uniform(sub, (cin, cout), jnp.float32, -stdv, stdv)
        b = jnp.zeros((cout,), jnp.float32)
        params.append((w, b))
    return params


def gcn_forward(x, adj, params):
    """GCN.forward: stack of (GraphConvolution -> LeakyReLU(0.1) -> dropout)."""
    n, cin0 = x.shape
    n_pad = _round_up(n, _SUBLANE)

    # Pad once; intermediates stay lane/sublane aligned. bf16 operands halve
    # HBM traffic on the dominant (N, N) adjacency read.
    adj_p = jnp.zeros((n_pad, n_pad), jnp.bfloat16).at[:n, :n].set(
        adj.astype(jnp.bfloat16))
    cin_pad = _round_up(cin0, _LANE)
    h = jnp.zeros((n_pad, cin_pad), jnp.bfloat16).at[:n, :cin0].set(
        x.astype(jnp.bfloat16))

    num_layers = len(params)
    y = None
    cout = cin0
    for li, (w, b) in enumerate(params):
        cin, cout = w.shape
        cin_p = _round_up(cin, _LANE)
        cout_p = _round_up(cout, _LANE)
        w_p = jnp.zeros((cin_p, cout_p), jnp.float32).at[:cin, :cout].set(w)
        b_p = jnp.zeros((1, cout_p), jnp.float32).at[0, :cout].set(b)

        is_last = li == num_layers - 1
        out_dtype = jnp.float32 if is_last else jnp.bfloat16
        # One fused kernel per layer: leaky_relu((adj @ h) @ W + b).
        y = _gcn_layer(adj_p, h, w_p, b_p, out_dtype=out_dtype)

        # TODO(synk): training-mode dropout(p=0.5) would use pltpu.prng_seed +
        # pltpu.prng_random_bits masking in the epilogue; eval mode is identity.
        h = y  # bf16 straight from the epilogue for non-final layers

    return y[:n, :cout]


def _reference_gcn(x, adj, params):
    """Pure-JAX f32 reference (eval mode)."""
    h = x
    for (w, b) in params:
        h = adj @ (h @ w) + b
        h = jnp.where(h >= 0.0, h, 0.1 * h)
    return h


if __name__ == "__main__":
    key = jax.random.PRNGKey(0)

    # Small synthetic problem: N=8 graph nodes, channels = [16, 32, 8]
    N = 8
    channels = [16, 32, 8]

    key, kx, kadj = jax.random.split(key, 3)
    x = jax.random.normal(kx, (N, channels[0]), jnp.float32)

    # Symmetric, row-normalized dense adjacency (what torch.sparse.mm would see).
    a = jax.random.uniform(kadj, (N, N), jnp.float32)
    a = (a + a.T) * 0.5 + jnp.eye(N, dtype=jnp.float32)
    adj = a / jnp.sum(a, axis=1, keepdims=True)

    params = init_gcn_params(key, channels)

    out = gcn_forward(x, adj, params)
    out = jax.block_until_ready(out)

    assert out.shape == (N, channels[-1]), out.shape
    assert jnp.all(jnp.isfinite(out))

    # Loose tolerance vs f32 reference (bf16 adj/activations, f32 accumulation).
    ref = _reference_gcn(x, adj, params)
    max_err = float(jnp.max(jnp.abs(out - ref)))
    assert max_err < 1e-1, f"max abs error vs reference: {max_err}"

    # Secondary check: a node count that exercises multiple row tiles.
    N2 = 48
    key, kx2, kadj2 = jax.random.split(key, 3)
    x2 = jax.random.normal(kx2, (N2, channels[0]), jnp.float32)
    a2 = jax.random.uniform(kadj2, (N2, N2), jnp.float32)
    a2 = (a2 + a2.T) * 0.5 + jnp.eye(N2, dtype=jnp.float32)
    adj2 = a2 / jnp.sum(a2, axis=1, keepdims=True)
    out2 = jax.block_until_ready(gcn_forward(x2, adj2, params))
    ref2 = _reference_gcn(x2, adj2, params)
    max_err2 = float(jnp.max(jnp.abs(out2 - ref2)))
    assert out2.shape == (N2, channels[-1]), out2.shape
    assert max_err2 < 1e-1, f"max abs error vs reference (N=48): {max_err2}"

    print("KERNEL_OK")
</pallas_src>

<mosaic_0001>
module attributes {stable_mosaic.version = 11 : i64} {
  func.func @_gcn_layer_kernel(%arg0: i32, %arg1: i32, %arg2: memref<16x16xbf16, #tpu.memory_space<vmem>>, %arg3: memref<16x128xbf16, #tpu.memory_space<vmem>>, %arg4: memref<128x128xf32, #tpu.memory_space<vmem>>, %arg5: memref<1x128xf32, #tpu.memory_space<vmem>>, %arg6: memref<16x128xbf16, #tpu.memory_space<vmem>>, %arg7: memref<16x128xf32, #tpu.memory_space<vmem>>) attributes {dimension_semantics = [#tpu.dimension_semantics<parallel>, #tpu.dimension_semantics<arbitrary>], iteration_bounds = array<i64: 1, 1>, scalar_prefetch = 0 : i64, scratch_operands = 1 : i64, tpu.core_type = #tpu.core_type<tc>, window_params = [{transform_indices = @transform_0, window_bounds = array<i64: 16, 16>}, {transform_indices = @transform_1, window_bounds = array<i64: 16, 128>}, {pipeline_mode = #tpu.pipeline_mode<synchronous>, transform_indices = @transform_2, window_bounds = array<i64: 128, 128>}, {pipeline_mode = #tpu.pipeline_mode<synchronous>, transform_indices = @transform_3, window_bounds = array<i64: 1, 128>}, {transform_indices = @transform_4, window_bounds = array<i64: 16, 128>}]} {
    %c0_i32 = arith.constant 0 : i32
    %0 = arith.cmpi eq, %arg1, %c0_i32 : i32
    %1 = arith.extui %0 : i1 to i32
    %c0_i32_0 = arith.constant 0 : i32
    %2 = arith.cmpi ne, %1, %c0_i32_0 : i32
    scf.if %2 {
      %cst_10 = arith.constant 0.000000e+00 : f32
      %12 = vector.broadcast %cst_10 : f32 to vector<16x128xf32>
      %c0_11 = arith.constant 0 : index
      %c0_12 = arith.constant 0 : index
      %13 = vector.load %arg7[%c0_11, %c0_12] : memref<16x128xf32, #tpu.memory_space<vmem>>, vector<16x128xf32>
      tpu.vector_store %arg7[%c0_11, %c0_12], %12 {strides = array<i32>} : memref<16x128xf32, #tpu.memory_space<vmem>>, vector<16x128xf32>,
    } else {
    }
    %c0 = arith.constant 0 : index
    %c0_1 = arith.constant 0 : index
    %3 = vector.load %arg7[%c0, %c0_1] : memref<16x128xf32, #tpu.memory_space<vmem>>, vector<16x128xf32>
    %c0_2 = arith.constant 0 : index
    %c0_3 = arith.constant 0 : index
    %4 = vector.load %arg2[%c0_2, %c0_3] : memref<16x16xbf16, #tpu.memory_space<vmem>>, vector<16x16xbf16>
    %c0_4 = arith.constant 0 : index
    %c0_5 = arith.constant 0 : index
    %5 = vector.load %arg3[%c0_4, %c0_5] : memref<16x128xbf16, #tpu.memory_space<vmem>>, vector<16x128xbf16>
    %cst = arith.constant dense<0.000000e+00> : vector<16x128xf32>
    %6 = tpu.matmul %4, %5, %cst {dimension_numbers = #tpu.dot_dimension_numbers<[1], [0], [0], [1], [0, 0, 1, 1], [], []>} : vector<16x16xbf16>, vector<16x128xbf16>, vector<16x128xf32> -> vector<16x128xf32>
    %7 = arith.addf %3, %6 : vector<16x128xf32>
    %c0_6 = arith.constant 0 : index
    %c0_7 = arith.constant 0 : index
    %8 = vector.load %arg7[%c0_6, %c0_7] : memref<16x128xf32, #tpu.memory_space<vmem>>, vector<16x128xf32>
    tpu.vector_store %arg7[%c0_6, %c0_7], %7 {strides = array<i32>} : memref<16x128xf32, #tpu.memory_space<vmem>>, vector<16x128xf32>,
    %c0_i32_8 = arith.constant 0 : i32
    %9 = arith.cmpi eq, %arg1, %c0_i32_8 : i32
    %10 = arith.extui %9 : i1 to i32
    %c0_i32_9 = arith.constant 0 : i32
    %11 = arith.cmpi ne, %10, %c0_i32_9 : i32
    scf.if %11 {
      %c0_10 = arith.constant 0 : index
      %c0_11 = arith.constant 0 : index
      %12 = vector.load %arg7[%c0_10, %c0_11] : memref<16x128xf32, #tpu.memory_space<vmem>>, vector<16x128xf32>
      %c0_12 = arith.constant 0 : index
      %c0_13 = arith.constant 0 : index
      %13 = vector.load %arg4[%c0_12, %c0_13] : memref<128x128xf32, #tpu.memory_space<vmem>>, vector<128x128xf32>
      %cst_14 = arith.constant dense<0.000000e+00> : vector<16x128xf32>
      %14 = tpu.matmul %12, %13, %cst_14 {dimension_numbers = #tpu.dot_dimension_numbers<[1], [0], [0], [1], [0, 0, 1, 1], [], []>} : vector<16x128xf32>, vector<128x128xf32>, vector<16x128xf32> -> vector<16x128xf32>
      %c0_15 = arith.constant 0 : index
      %c0_16 = arith.constant 0 : index
      %15 = vector.load %arg5[%c0_15, %c0_16] : memref<1x128xf32, #tpu.memory_space<vmem>>, vector<1x128xf32>
      %16 = vector.broadcast %15 : vector<1x128xf32> to vector<16x128xf32>
      %17 = arith.addf %14, %16 : vector<16x128xf32>
      %cst_17 = arith.constant 0.000000e+00 : f32
      %18 = vector.broadcast %cst_17 : f32 to vector<16x128xf32>
      %19 = arith.cmpf oge, %17, %18 : vector<16x128xf32>
      %cst_18 = arith.constant 1.000000e-01 : f32
      %20 = vector.broadcast %cst_18 : f32 to vector<16x128xf32>
      %21 = arith.mulf %20, %17 : vector<16x128xf32>
      %22 = arith.select %19, %17, %21 : vector<16x128xi1>, vector<16x128xf32>
      %23 = arith.truncf %22 : vector<16x128xf32> to vector<16x128xbf16>
      %c0_19 = arith.constant 0 : index
      %c0_20 = arith.constant 0 : index
      %24 = vector.load %arg6[%c0_19, %c0_20] : memref<16x128xbf16, #tpu.memory_space<vmem>>, vector<16x128xbf16>
      tpu.vector_store %arg6[%c0_19, %c0_20], %23 {strides = array<i32>} : memref<16x128xbf16, #tpu.memory_space<vmem>>, vector<16x128xbf16>,
    } else {
    }
    return
  }
  func.func @transform_0(%arg0: i32, %arg1: i32) -> (i32, i32) {
    %c0_i32 = arith.constant 0 : i32
    return %arg0, %arg1 : i32, i32
  }
  func.func @transform_1(%arg0: i32, %arg1: i32) -> (i32, i32) {
    %c0_i32 = arith.constant 0 : i32
    %c0_i32_0 = arith.constant 0 : i32
    return %arg1, %c0_i32 : i32, i32
  }
  func.func @transform_2(%arg0: i32, %arg1: i32) -> (i32, i32) {
    %c0_i32 = arith.constant 0 : i32
    %c0_i32_0 = arith.constant 0 : i32
    %c0_i32_1 = arith.constant 0 : i32
    return %c0_i32, %c0_i32_0 : i32, i32
  }
  func.func @transform_3(%arg0: i32, %arg1: i32) -> (i32, i32) {
    %c0_i32 = arith.constant 0 : i32
    %c0_i32_0 = arith.constant 0 : i32
    %c0_i32_1 = arith.constant 0 : i32
    return %c0_i32, %c0_i32_0 : i32, i32
  }
  func.func @transform_4(%arg0: i32, %arg1: i32) -> (i32, i32) {
    %c0_i32 = arith.constant 0 : i32
    %c0_i32_0 = arith.constant 0 : i32
    return %arg0, %c0_i32 : i32, i32
  }
}

</mosaic_0001>

<bundles_post_ra>
// kernel: tpu_custom_call.1
= control target key start
LH: loop header
LB: loop body
LE: loop exit
PB: predicated region body
PF: predicated region fallthrough
CT: control target
= control target key end

     0   :  { %9 = vsyncpa [#allocation4], 0  ;;  %s389_s0 = inlined_call_operand.hbm [shape: bf16[16,16], index: 0, kind: input, shape index: {}]   ;;  %s390_s1 = inlined_call_operand.hbm [shape: bf16[16,128], index: 1, kind: input, shape index: {}]   ;;  %s391_s2 = inlined_call_operand.hbm [shape: f32[128,128], index: 2, kind: input, shape index: {}]   ;;  %s392_s3 = inlined_call_operand.vmem [shape: f32[1,128], index: 3, kind: input, shape index: {}]   ;;  %s393_s4 = inlined_call_operand.hbm [shape: bf16[16,128], index: 4, kind: output, shape index: {}]  }
   0x1   :  { %10 = vsyncpa [#allocation7], 0 }
   0x2   :  { %11 = vsyncpa [#allocation5], 0  ;;  %s29_s17 = sshll.u32 %s390_s1, 4  ;;  %s332_s18 = smov [#allocation6]   ;;  %s30_s17 = int_to_ptr.hbm [resolvable:$true] %s29_s17 }
   0x3   :  { %s31_s19 = sshll.u32 %s332_s18, 4  ;;  %s16_s22 = sshll.u32 %s389_s0, 4  ;;  %s32_s19 = int_to_ptr.vmem [resolvable:$true] %s31_s19  ;;  %s17_s22 = int_to_ptr.hbm [resolvable:$true] %s16_s22 }
   0x4   :  { %s333_s23 = smov 64   ;;  %s334_s24 = smov 4  }
   0x5   :  { %37 = dma.hbm_to_vmem [thread:$0]  %s30_s17, 128, %s32_s19, [#allocation7], %s333_s23, %s333_s23, %s334_s24  }
   0x6   :  { %s335_s25 = smov [#allocation3]   ;;  %s42_s1 = sshll.u32 %s391_s2, 4  ;;  %s43_s1 = int_to_ptr.hbm [resolvable:$true] %s42_s1 }
   0x7   :  { %s18_s26 = sshll.u32 %s335_s25, 4  ;;  %s336_s0 = smov [#allocation8]   ;;  %s19_s26 = int_to_ptr.vmem [resolvable:$true] %s18_s26 }
   0x8   :  { %24 = dma.hbm_to_vmem [thread:$0]  %s17_s22, 128, %s19_s26, [#allocation4], %s333_s23, %s333_s23, %s334_s24  }
   0x9   :  { %s44_s29 = sshll.u32 %s336_s0, 4  ;;  %s337_s30 = smov 128   ;;  %s45_s29 = int_to_ptr.vmem [resolvable:$true] %s44_s29 }
   0xa   :  { %s338_s5 = smov 8  }
   0xb   :  { %50 = dma.hbm_to_vmem [thread:$0]  %s43_s1, 2048, %s45_s29, [#allocation7], %s337_s30, %s337_s30, %s338_s5  }
   0xc   :  { %326 = dma.done.wait [#allocation4], 128  }
   0xd   :  { %327 = vsyncadd [#allocation4], 4294967168 }
   0xe   :  { %328 = dma.done.wait [#allocation7], 2176  }
   0xf   :  { %329 = vsyncadd [#allocation7], 4294965120  ;;  %v199_v0 = vld [vmem:[#allocation6] sm:$0xff]  ;;  %v198_v2 = vld [vmem:[#allocation3] sm:$0xff]  ;;  %vm89_vm0 = vcmask 130048   ;;  %s339_s7 = smov [#allocation9]  }
  0x10   :  { %v131_v1 = vld [vmem:[#allocation8 + $0x78] sm:$0xff]  ;;  %v130_v3 = vld [vmem:[#allocation8 + $0x70] sm:$0xff]  ;;  %100 = vmatpush.bf16.msra.mxu0 %v199_v0  ;;  %v129_v4 = vld [vmem:[#allocation8 + $0x68] sm:$0xff]  ;;  %s173_s8 = sshll.u32 %s339_s7, 4  ;;  %s175_s11 = sshll.u32 %s393_s4, 4  ;;  %s174_s8 = int_to_ptr.vmem [resolvable:$true] %s173_s8  ;;  %s176_s11 = int_to_ptr.hbm [resolvable:$true] %s175_s11 }
  0x11   :  { %136 = vmatpush.msra.mxu1 %v131_v1  ;;  %205 = vmatpush.msra.mxu2 %v131_v1  ;;  %v128_v5 = vld [vmem:[#allocation8 + $0x60] sm:$0xff]  ;;  %v127_v6 = vld [vmem:[#allocation8 + $0x58] sm:$0xff]  ;;  %v126_v7 = vld [vmem:[#allocation8 + $0x50] sm:$0xff] }
  0x12   :  { %v125_v8 = vld [vmem:[#allocation8 + $0x48] sm:$0xff]  ;;  %v124_v9 = vld [vmem:[#allocation8 + $0x40] sm:$0xff]  ;;  %v123_v10 = vld [vmem:[#allocation8 + $0x38] sm:$0xff] }
  0x13   :  { %137 = vmatpush.msra.mxu1 %v130_v3  ;;  %206 = vmatpush.msra.mxu2 %v130_v3  ;;  %v122_v11 = vld [vmem:[#allocation8 + $0x30] sm:$0xff]  ;;  %v121_v12 = vld [vmem:[#allocation8 + $0x28] sm:$0xff]  ;;  %v120_v13 = vld [vmem:[#allocation8 + $0x20] sm:$0xff] }
  0x14   :  { %197 = vmatmul.msk.bf16.vlgmr.msra.gmra.mxu0 %vm89_vm0, %v198_v2  ;;  %v119_v14 = vld [vmem:[#allocation8 + $0x18] sm:$0xff]  ;;  %v118_v15 = vld [vmem:[#allocation8 + $0x10] sm:$0xff]  ;;  %v117_v16 = vld [vmem:[#allocation8 + $0x8] sm:$0xff] }
  0x15   :  { %138 = vmatpush.msra.mxu1 %v129_v4  ;;  %207 = vmatpush.msra.mxu2 %v129_v4  ;;  %v116_v17 = vld [vmem:[#allocation8] sm:$0xff]  ;;  %v229_v20 = vld [vmem:[%s392_s3] ss:$0 sm:$0xff] }
  0x17   :  { %139 = vmatpush.msra.mxu1 %v128_v5  ;;  %208 = vmatpush.msra.mxu2 %v128_v5 }
  0x19   :  { %140 = vmatpush.msra.mxu1 %v127_v6  ;;  %209 = vmatpush.msra.mxu2 %v127_v6 }
  0x1b   :  { %141 = vmatpush.msra.mxu1 %v126_v7  ;;  %210 = vmatpush.msra.mxu2 %v126_v7 }
  0x1d   :  { %142 = vmatpush.msra.mxu1 %v125_v8  ;;  %211 = vmatpush.msra.mxu2 %v125_v8 }
  0x1f   :  { %143 = vmatpush.msra.mxu1 %v124_v9  ;;  %212 = vmatpush.msra.mxu2 %v124_v9 }
  0x21   :  { %144 = vmatpush.msra.mxu1 %v123_v10  ;;  %213 = vmatpush.msra.mxu2 %v123_v10 }
  0x23   :  { %145 = vmatpush.msra.mxu1 %v122_v11  ;;  %214 = vmatpush.msra.mxu2 %v122_v11 }
  0x25   :  { %146 = vmatpush.msra.mxu1 %v121_v12  ;;  %215 = vmatpush.msra.mxu2 %v121_v12 }
  0x27   :  { %147 = vmatpush.msra.mxu1 %v120_v13  ;;  %216 = vmatpush.msra.mxu2 %v120_v13 }
  0x29   :  { %148 = vmatpush.msra.mxu1 %v119_v14  ;;  %217 = vmatpush.msra.mxu2 %v119_v14 }
  0x2b   :  { %149 = vmatpush.msra.mxu1 %v118_v15  ;;  %218 = vmatpush.msra.mxu2 %v118_v15 }
  0x2d   :  { %150 = vmatpush.msra.mxu1 %v117_v16  ;;  %219 = vmatpush.msra.mxu2 %v117_v16 }
  0x2f   :  { %151 = vmatpush.msra.mxu1 %v116_v17  ;;  %220 = vmatpush.msra.mxu2 %v116_v17 }
  0x91   :  { %v102_v18 = vpop.f32.mrf.mxu0 }
  0x92   :  { %152 = vmatmul.f32.vlgmr.msra.gmra.mxu1 %v102_v18 }
  0x99   :  { %v104_v19 = vpop.f32.mrf.mxu0 }
  0x9a   :  { %155 = vmatmul.f32.vlgmr.msra.gmra.mxu2 %v104_v19 }
 0x10f   :  { %v153_v21 = vpop.f32.mrf.mxu1 }
 0x110   :  { %v154_v22 = vadd.f32 %v229_v20, %v153_v21 }
 0x112   :  { %v161_v24 = vmul.f32 0.1, %v154_v22  ;;  %vm159_vm1 = vcmp.ge.f32.partialorder %v154_v22, 0.0 }
 0x114   :  { %v163_v27 = vsel %vm159_vm1, %v154_v22, %v161_v24 }
 0x11d   :  { %v156_v23 = vpop.f32.mrf.mxu2 }
 0x11e   :  { %v157_v25 = vadd.f32 %v229_v20, %v156_v23 }
 0x120   :  { %vm160_vm2 = vcmp.ge.f32.partialorder %v157_v25, 0.0  ;;  %v162_v26 = vmul.f32 0.1, %v157_v25 }
 0x122   :  { %v164_v28 = vsel %vm160_vm2, %v157_v25, %v162_v26 }
 0x123   :  { %v203_v29 = vpack.c.bf16 %v164_v28, %v163_v27 }
 0x125   :  { %204 = vst [vmem:[#allocation9] sm:$0xff] %v203_v29  }
 0x126   :  { %181 = dma.vmem_to_hbm [thread:$0]  %s174_s8, 128, %s176_s11, [#allocation5], %s333_s23, %s333_s23, %s334_s24  }
 0x127   :  { %330 = dma.done.wait [#allocation5], 128  }
 0x128   :  { %331 = vsyncadd [#allocation5], 4294967168 }
 0x129   :  { %186 = vsyncpa [#allocation4], 1 }
 0x12a   :  { %187 = vsyncpa [#allocation7], 1 }
 0x12b   :  { %188 = vsyncpa [#allocation5], 1 }

</bundles_post_ra>
